<compile_context>
chip_gen: v5e
topology: v5e:2x2
jax: 0.10.0
libtpu: 0.0.40
codegen_flags: <defaults>
</compile_context>

<pallas_src>
import jax
import jax.numpy as jnp
from jax.experimental import pallas as pl
from jax.experimental.pallas import tpu as pltpu

LN_EPS = 1e-5  # PyTorch nn.LayerNorm default


def _patch_merge_kernel(xe_ref, xo_ref, we_ref, wo_ref, b_ref, o_ref):
    """Fused 2x2 gather + LayerNorm(4C) + Linear(4C -> 2C, bias-free).

    xe_ref: (th, Wp2, 2C) input dtype -- even image rows: [x0 || x2] per token
    xo_ref: (th, Wp2, 2C) input dtype -- odd  image rows: [x1 || x3] per token
    we_ref: (2C, 2C) bf16 -- gamma-folded weight rows for [x0; x2]
    wo_ref: (2C, 2C) bf16 -- gamma-folded weight rows for [x1; x3]
    b_ref:  (1, 2C)  f32  -- beta @ W^T
    o_ref:  (th*Wp2, 2C)  output dtype
    """
    xe = xe_ref[...].astype(jnp.float32)   # (th, Wp2, 2C)
    xo = xo_ref[...].astype(jnp.float32)
    th, wp2, c2 = xe.shape
    inv_n = 1.0 / (2 * c2)                 # 1 / (4C)

    # Single-pass LayerNorm statistics over the full 4C vector (f32).
    # One XLU lane-reduce per statistic; pairing is done with VPU adds.
    s = jnp.sum(xe + xo, axis=-1, keepdims=True)
    sq = jnp.sum(xe * xe + xo * xo, axis=-1, keepdims=True)
    mean = s * inv_n
    var = jnp.maximum(sq * inv_n - mean * mean, 0.0)
    inv = jax.lax.rsqrt(var + LN_EPS)
    shift = -mean * inv                    # (th, Wp2, 1)

    rows = th * wp2
    # Normalize without materializing (x - mean); cast to bf16 BEFORE the
    # reshape so any sublane relayout moves half the bytes.
    xen = (xe * inv + shift).astype(jnp.bfloat16).reshape(rows, c2)
    xon = (xo * inv + shift).astype(jnp.bfloat16).reshape(rows, c2)

    # bf16 MXU matmuls with f32 accumulation; second dot accumulates into
    # the first, bias added once.
    acc = jnp.dot(xen, we_ref[...], preferred_element_type=jnp.float32)
    acc = acc + jnp.dot(xon, wo_ref[...], preferred_element_type=jnp.float32)
    o_ref[...] = (acc + b_ref[...]).astype(o_ref.dtype)


def _default_vmem_limit():
    """min(64 MiB, 3/4 of physical VMEM): raises the v5e default, respects v7x."""
    try:
        cap = pltpu.get_tpu_info().vmem_capacity_bytes
    except Exception:  # capability probe only; never hides kernel errors
        cap = 128 * 1024 * 1024
    return int(min(64 * 1024 * 1024, (cap * 3) // 4))


def _target_rows(C2, in_itemsize, out_itemsize, vmem_limit_bytes):
    """Merged-token budget per grid step, scaled by channel width and VMEM."""
    per_row = C2 * (2 * 2 * in_itemsize    # xe/xo streams, double-buffered
                    + 2 * out_itemsize     # output, double-buffered
                    + 4 * 4                # f32 LN temporaries in the kernel
                    + 2 * 2)               # bf16 normalized activations
    weight_bytes = 2 * 2 * (C2 * C2 * 2) + 2 * C2 * 4  # we/wo dbl-buffered + bias
    budget = vmem_limit_bytes - weight_bytes - (2 << 20)  # headroom
    cap = 1024 if C2 <= 512 else 512
    return int(max(8, min(cap, budget // max(per_row, 1))))


def _pick_row_tile(M, Wp2, target_rows):
    """Pick th | M such that the output block (th*Wp2 rows) is legal and as
    large as possible without exceeding `target_rows` merged tokens."""
    divisors = [d for d in range(1, M + 1) if M % d == 0]
    valid = [d for d in divisors if d == M or (d * Wp2) % 8 == 0]
    small = [d for d in valid if d * Wp2 <= target_rows]
    if small:
        return max(small)
    # TODO(synk): if even the smallest legal tile exceeds the VMEM budget
    # (odd Wp2 with a prime M at huge C), switch to masked non-dividing tiles.
    return min(valid)  # non-empty: M itself is always valid


def patch_merging_forward(x, H, W, gamma, beta, weight, *, vmem_limit_bytes=None):
    """Pallas implementation of PatchMerging.forward.

    x:      (B, H*W, C)
    gamma:  (4C,)     LayerNorm weight
    beta:   (4C,)     LayerNorm bias
    weight: (2C, 4C)  nn.Linear weight (PyTorch layout: out_features x in_features)
    returns (B, ceil(H/2)*ceil(W/2), 2C) in x.dtype
    """
    B, L, C = x.shape
    assert L == H * W, "input feature has wrong size"
    C2 = 2 * C

    # ---- gather preparation: copy-free views only (pad only if H/W odd) ----
    xg = x.reshape(B, H, W, C)
    if (H % 2) or (W % 2):
        xg = jnp.pad(xg, ((0, 0), (0, H % 2), (0, W % 2), (0, 0)))
    Hp, Wp = xg.shape[1], xg.shape[2]
    Hp2, Wp2 = Hp // 2, Wp // 2
    # Flatten batch into the row-pair axis (copy-free):
    # (B*Hp2, 2, Wp2, 2C); element (r, di, j, :) = [x[.,2i+di,2j,:] || x[.,2i+di,2j+1,:]]
    x4 = xg.reshape(B * Hp2, 2, Wp2, C2)
    M = B * Hp2

    # ---- fold LayerNorm affine into the reduction weight (tiny, done once) ----
    w_t = weight.astype(jnp.float32).T                      # (4C, 2C)
    w_g = gamma.astype(jnp.float32)[:, None] * w_t          # (4C, 2C)
    b_f = (beta.astype(jnp.float32) @ w_t).reshape(1, C2)   # (1, 2C), f32
    # Reference concat order is [x0, x1, x2, x3]; even rows carry [x0||x2],
    # odd rows carry [x1||x3].
    we = jnp.concatenate([w_g[0:C], w_g[2 * C:3 * C]], axis=0).astype(jnp.bfloat16)
    wo = jnp.concatenate([w_g[C:2 * C], w_g[3 * C:4 * C]], axis=0).astype(jnp.bfloat16)

    # ---- VMEM-aware row tiling over the single flattened grid axis ----
    if vmem_limit_bytes is None:
        vmem_limit_bytes = _default_vmem_limit()
    target_rows = _target_rows(C2, x.dtype.itemsize, x.dtype.itemsize,
                               vmem_limit_bytes)
    th = _pick_row_tile(M, Wp2, target_rows)
    n_it = M // th
    rows = th * Wp2

    out = pl.pallas_call(
        _patch_merge_kernel,
        out_shape=jax.ShapeDtypeStruct((M * Wp2, C2), x.dtype),
        grid_spec=pltpu.PrefetchScalarGridSpec(
            num_scalar_prefetch=0,
            grid=(n_it,),
            in_specs=[
                # even image rows of the tile: (th, Wp2, 2C)
                pl.BlockSpec((th, None, Wp2, C2), lambda i: (i, 0, 0, 0)),
                # odd image rows of the tile: (th, Wp2, 2C)
                pl.BlockSpec((th, None, Wp2, C2), lambda i: (i, 1, 0, 0)),
                pl.BlockSpec((C2, C2), lambda i: (0, 0)),
                pl.BlockSpec((C2, C2), lambda i: (0, 0)),
                pl.BlockSpec((1, C2), lambda i: (0, 0)),
            ],
            out_specs=pl.BlockSpec((rows, C2), lambda i: (i, 0)),
        ),
        compiler_params=pltpu.CompilerParams(
            dimension_semantics=("parallel",),
            vmem_limit_bytes=vmem_limit_bytes,
        ),
    )(x4, x4, we, wo, b_f)

    return out.reshape(B, Hp2 * Wp2, C2)


def _reference_forward(x, H, W, gamma, beta, weight):
    """Pure-JAX f32 reference mirroring the PyTorch module."""
    B, L, C = x.shape
    xg = x.astype(jnp.float32).reshape(B, H, W, C)
    if (H % 2) or (W % 2):
        xg = jnp.pad(xg, ((0, 0), (0, H % 2), (0, W % 2), (0, 0)))
    x0 = xg[:, 0::2, 0::2, :]
    x1 = xg[:, 1::2, 0::2, :]
    x2 = xg[:, 0::2, 1::2, :]
    x3 = xg[:, 1::2, 1::2, :]
    xm = jnp.concatenate([x0, x1, x2, x3], axis=-1).reshape(B, -1, 4 * C)
    mean = jnp.mean(xm, axis=-1, keepdims=True)
    var = jnp.mean((xm - mean) ** 2, axis=-1, keepdims=True)
    xn = (xm - mean) * jax.lax.rsqrt(var + LN_EPS)
    y = xn * gamma.astype(jnp.float32) + beta.astype(jnp.float32)
    return (y @ weight.astype(jnp.float32).T).astype(x.dtype)


if __name__ == "__main__":
    key = jax.random.PRNGKey(0)
    B, H, W, C = 2, 8, 8, 32  # dim = 32
    k1, k2, k3, k4 = jax.random.split(key, 4)

    x = jax.random.normal(k1, (B, H * W, C), dtype=jnp.float32)
    # Synthetic params: LayerNorm(4*dim), Linear(4*dim -> 2*dim, bias=False)
    gamma = 1.0 + 0.01 * jax.random.normal(k2, (4 * C,), dtype=jnp.float32)
    beta = 0.01 * jax.random.normal(k3, (4 * C,), dtype=jnp.float32)
    weight = 0.02 * jax.random.normal(k4, (2 * C, 4 * C), dtype=jnp.float32)

    out = jax.block_until_ready(patch_merging_forward(x, H, W, gamma, beta, weight))
    ref = _reference_forward(x, H, W, gamma, beta, weight)
    assert out.shape == (B, (H // 2) * (W // 2), 2 * C), out.shape
    err = float(jnp.max(jnp.abs(out.astype(jnp.float32) - ref.astype(jnp.float32))))
    assert err < 1e-2, f"max abs err {err}"

    # Odd spatial size exercises the zero-padding path.
    H2, W2 = 7, 7
    x_odd = jax.random.normal(jax.random.PRNGKey(1), (B, H2 * W2, C), dtype=jnp.float32)
    out2 = jax.block_until_ready(
        patch_merging_forward(x_odd, H2, W2, gamma, beta, weight))
    ref2 = _reference_forward(x_odd, H2, W2, gamma, beta, weight)
    assert out2.shape == (B, 4 * 4, 2 * C), out2.shape
    err2 = float(jnp.max(jnp.abs(out2.astype(jnp.float32) - ref2.astype(jnp.float32))))
    assert err2 < 1e-2, f"max abs err (odd) {err2}"

    print("KERNEL_OK")
</pallas_src>

<mosaic_0001>
module attributes {stable_mosaic.version = 11 : i64} {
  func.func @_patch_merge_kernel(%arg0: i32, %arg1: memref<8x1x4x64xf32, #tpu.memory_space<vmem>>, %arg2: memref<8x1x4x64xf32, #tpu.memory_space<vmem>>, %arg3: memref<64x64xbf16, #tpu.memory_space<vmem>>, %arg4: memref<64x64xbf16, #tpu.memory_space<vmem>>, %arg5: memref<1x64xf32, #tpu.memory_space<vmem>>, %arg6: memref<32x64xf32, #tpu.memory_space<vmem>>) attributes {dimension_semantics = [#tpu.dimension_semantics<parallel>], iteration_bounds = array<i64: 1>, scalar_prefetch = 0 : i64, scratch_operands = 0 : i64, tpu.core_type = #tpu.core_type<tc>, window_params = [{transform_indices = @transform_0, window_bounds = array<i64: 8, 1, 4, 64>}, {transform_indices = @transform_1, window_bounds = array<i64: 8, 1, 4, 64>}, {pipeline_mode = #tpu.pipeline_mode<synchronous>, transform_indices = @transform_2, window_bounds = array<i64: 64, 64>}, {pipeline_mode = #tpu.pipeline_mode<synchronous>, transform_indices = @transform_3, window_bounds = array<i64: 64, 64>}, {pipeline_mode = #tpu.pipeline_mode<synchronous>, transform_indices = @transform_4, window_bounds = array<i64: 1, 64>}, {transform_indices = @transform_5, window_bounds = array<i64: 32, 64>}]} {
    %c0 = arith.constant 0 : index
    %c0_0 = arith.constant 0 : index
    %c0_1 = arith.constant 0 : index
    %c0_2 = arith.constant 0 : index
    %0 = vector.load %arg1[%c0, %c0_0, %c0_1, %c0_2] : memref<8x1x4x64xf32, #tpu.memory_space<vmem>>, vector<8x1x4x64xf32>
    %1 = vector.shape_cast %0 : vector<8x1x4x64xf32> to vector<8x4x64xf32>
    %c0_3 = arith.constant 0 : index
    %c0_4 = arith.constant 0 : index
    %c0_5 = arith.constant 0 : index
    %c0_6 = arith.constant 0 : index
    %2 = vector.load %arg2[%c0_3, %c0_4, %c0_5, %c0_6] : memref<8x1x4x64xf32, #tpu.memory_space<vmem>>, vector<8x1x4x64xf32>
    %3 = vector.shape_cast %2 : vector<8x1x4x64xf32> to vector<8x4x64xf32>
    %4 = arith.addf %1, %3 : vector<8x4x64xf32>
    %cst = arith.constant dense<0.000000e+00> : vector<8x4xf32>
    %5 = vector.multi_reduction <add>, %4, %cst [2] : vector<8x4x64xf32> to vector<8x4xf32>
    %6 = vector.shape_cast %5 : vector<8x4xf32> to vector<8x4x1xf32>
    %7 = arith.mulf %1, %1 : vector<8x4x64xf32>
    %8 = arith.mulf %3, %3 : vector<8x4x64xf32>
    %9 = arith.addf %7, %8 : vector<8x4x64xf32>
    %cst_7 = arith.constant dense<0.000000e+00> : vector<8x4xf32>
    %10 = vector.multi_reduction <add>, %9, %cst_7 [2] : vector<8x4x64xf32> to vector<8x4xf32>
    %11 = vector.shape_cast %10 : vector<8x4xf32> to vector<8x4x1xf32>
    %cst_8 = arith.constant 7.812500e-03 : f32
    %12 = vector.broadcast %cst_8 : f32 to vector<8x4x1xf32>
    %13 = arith.mulf %6, %12 : vector<8x4x1xf32>
    %cst_9 = arith.constant 7.812500e-03 : f32
    %14 = vector.broadcast %cst_9 : f32 to vector<8x4x1xf32>
    %15 = arith.mulf %11, %14 : vector<8x4x1xf32>
    %16 = arith.mulf %13, %13 : vector<8x4x1xf32>
    %17 = arith.subf %15, %16 : vector<8x4x1xf32>
    %cst_10 = arith.constant 0.000000e+00 : f32
    %18 = vector.broadcast %cst_10 : f32 to vector<8x4x1xf32>
    %19 = arith.maximumf %17, %18 : vector<8x4x1xf32>
    %cst_11 = arith.constant 9.99999974E-6 : f32
    %20 = vector.broadcast %cst_11 : f32 to vector<8x4x1xf32>
    %21 = arith.addf %19, %20 : vector<8x4x1xf32>
    %22 = math.rsqrt %21 : vector<8x4x1xf32>
    %cst_12 = arith.constant 0.000000e+00 : f32
    %23 = vector.broadcast %cst_12 : f32 to vector<8x4x1xf32>
    %24 = arith.subf %23, %13 : vector<8x4x1xf32>
    %25 = arith.mulf %24, %22 : vector<8x4x1xf32>
    %26 = vector.broadcast %22 : vector<8x4x1xf32> to vector<8x4x64xf32>
    %27 = arith.mulf %1, %26 : vector<8x4x64xf32>
    %28 = vector.broadcast %25 : vector<8x4x1xf32> to vector<8x4x64xf32>
    %29 = arith.addf %27, %28 : vector<8x4x64xf32>
    %30 = arith.truncf %29 : vector<8x4x64xf32> to vector<8x4x64xbf16>
    %31 = vector.shape_cast %30 : vector<8x4x64xbf16> to vector<32x64xbf16>
    %32 = vector.broadcast %22 : vector<8x4x1xf32> to vector<8x4x64xf32>
    %33 = arith.mulf %3, %32 : vector<8x4x64xf32>
    %34 = vector.broadcast %25 : vector<8x4x1xf32> to vector<8x4x64xf32>
    %35 = arith.addf %33, %34 : vector<8x4x64xf32>
    %36 = arith.truncf %35 : vector<8x4x64xf32> to vector<8x4x64xbf16>
    %37 = vector.shape_cast %36 : vector<8x4x64xbf16> to vector<32x64xbf16>
    %c0_13 = arith.constant 0 : index
    %c0_14 = arith.constant 0 : index
    %38 = vector.load %arg3[%c0_13, %c0_14] : memref<64x64xbf16, #tpu.memory_space<vmem>>, vector<64x64xbf16>
    %cst_15 = arith.constant dense<0.000000e+00> : vector<32x64xf32>
    %39 = tpu.matmul %31, %38, %cst_15 {dimension_numbers = #tpu.dot_dimension_numbers<[1], [0], [0], [1], [0, 0, 1, 1], [], []>} : vector<32x64xbf16>, vector<64x64xbf16>, vector<32x64xf32> -> vector<32x64xf32>
    %c0_16 = arith.constant 0 : index
    %c0_17 = arith.constant 0 : index
    %40 = vector.load %arg4[%c0_16, %c0_17] : memref<64x64xbf16, #tpu.memory_space<vmem>>, vector<64x64xbf16>
    %cst_18 = arith.constant dense<0.000000e+00> : vector<32x64xf32>
    %41 = tpu.matmul %37, %40, %cst_18 {dimension_numbers = #tpu.dot_dimension_numbers<[1], [0], [0], [1], [0, 0, 1, 1], [], []>} : vector<32x64xbf16>, vector<64x64xbf16>, vector<32x64xf32> -> vector<32x64xf32>
    %42 = arith.addf %39, %41 : vector<32x64xf32>
    %c0_19 = arith.constant 0 : index
    %c0_20 = arith.constant 0 : index
    %43 = vector.load %arg5[%c0_19, %c0_20] : memref<1x64xf32, #tpu.memory_space<vmem>>, vector<1x64xf32>
    %44 = vector.broadcast %43 : vector<1x64xf32> to vector<32x64xf32>
    %45 = arith.addf %42, %44 : vector<32x64xf32>
    %c0_21 = arith.constant 0 : index
    %c0_22 = arith.constant 0 : index
    %46 = vector.load %arg6[%c0_21, %c0_22] : memref<32x64xf32, #tpu.memory_space<vmem>>, vector<32x64xf32>
    tpu.vector_store %arg6[%c0_21, %c0_22], %45 {strides = array<i32>} : memref<32x64xf32, #tpu.memory_space<vmem>>, vector<32x64xf32>,
    return
  }
  func.func @transform_0(%arg0: i32) -> (i32, i32, i32, i32) {
    %c0_i32 = arith.constant 0 : i32
    %c0_i32_0 = arith.constant 0 : i32
    %c0_i32_1 = arith.constant 0 : i32
    %c0_i32_2 = arith.constant 0 : i32
    return %arg0, %c0_i32, %c0_i32_0, %c0_i32_1 : i32, i32, i32, i32
  }
  func.func @transform_1(%arg0: i32) -> (i32, i32, i32, i32) {
    %c1_i32 = arith.constant 1 : i32
    %c0_i32 = arith.constant 0 : i32
    %c0_i32_0 = arith.constant 0 : i32
    %c0_i32_1 = arith.constant 0 : i32
    return %arg0, %c1_i32, %c0_i32, %c0_i32_0 : i32, i32, i32, i32
  }
  func.func @transform_2(%arg0: i32) -> (i32, i32) {
    %c0_i32 = arith.constant 0 : i32
    %c0_i32_0 = arith.constant 0 : i32
    %c0_i32_1 = arith.constant 0 : i32
    return %c0_i32, %c0_i32_0 : i32, i32
  }
  func.func @transform_3(%arg0: i32) -> (i32, i32) {
    %c0_i32 = arith.constant 0 : i32
    %c0_i32_0 = arith.constant 0 : i32
    %c0_i32_1 = arith.constant 0 : i32
    return %c0_i32, %c0_i32_0 : i32, i32
  }
  func.func @transform_4(%arg0: i32) -> (i32, i32) {
    %c0_i32 = arith.constant 0 : i32
    %c0_i32_0 = arith.constant 0 : i32
    %c0_i32_1 = arith.constant 0 : i32
    return %c0_i32, %c0_i32_0 : i32, i32
  }
  func.func @transform_5(%arg0: i32) -> (i32, i32) {
    %c0_i32 = arith.constant 0 : i32
    %c0_i32_0 = arith.constant 0 : i32
    return %arg0, %c0_i32 : i32, i32
  }
}

</mosaic_0001>

<bundles_post_ra>
// kernel: tpu_custom_call.1
= control target key start
LH: loop header
LB: loop body
LE: loop exit
PB: predicated region body
PF: predicated region fallthrough
CT: control target
= control target key end

     0   :  { %10 = vsyncpa [#allocation3], 0  ;;  %s1046_s0 = inlined_call_operand.hbm [shape: f32[8,2,4,64], index: 0, kind: input, shape index: {}]   ;;  %s1047_s1 = inlined_call_operand.hbm [shape: f32[8,2,4,64], index: 1, kind: input, shape index: {}]   ;;  %s1048_s2 = inlined_call_operand.hbm [shape: bf16[64,64], index: 2, kind: input, shape index: {}]   ;;  %s1049_s3 = inlined_call_operand.hbm [shape: bf16[64,64], index: 3, kind: input, shape index: {}]   ;;  %s1050_s4 = inlined_call_operand.vmem [shape: f32[1,64], index: 4, kind: input, shape index: {}]   ;;  %s1051_s5 = inlined_call_operand.hbm [shape: f32[32,64], index: 5, kind: output, shape index: {}]  }
   0x1   :  { %11 = vsyncpa [#allocation6], 0 }
   0x2   :  { %12 = vsyncpa [#allocation9], 0 }
   0x3   :  { %13 = vsyncpa [#allocation4], 0  ;;  %s31_s20 = scalar_lea.hbm %s1047_s1, 4  ;;  %s775_s22 = smov [#allocation5]  }
   0x4   :  { %s32_s21 = sshll.u32 %s31_s20, 4  ;;  %s34_s23 = sshll.u32 %s775_s22, 4  ;;  %s33_s21 = int_to_ptr.hbm [resolvable:$true] %s32_s21  ;;  %s35_s23 = int_to_ptr.vmem [resolvable:$true] %s34_s23 }
   0x5   :  { %s18_s26 = sshll.u32 %s1046_s0, 4  ;;  %s776_s27 = smov 128   ;;  %s19_s26 = int_to_ptr.hbm [resolvable:$true] %s18_s26 }
   0x6   :  { %s777_s28 = smov 64   ;;  %s778_s29 = smov 4  }
   0x7   :  { %40 = dma.hbm_to_vmem [thread:$0]  %s33_s21, 512, %s35_s23, [#allocation6], %s776_s27, %s777_s28, %s778_s29  }
   0x8   :  { %s779_s30 = smov [#allocation2]   ;;  %s45_s1 = sshll.u32 %s1048_s2, 4  ;;  %s46_s1 = int_to_ptr.hbm [resolvable:$true] %s45_s1 }
   0x9   :  { %s20_s6 = sshll.u32 %s779_s30, 4  ;;  %s58_s0 = sshll.u32 %s1049_s3, 4  ;;  %s21_s6 = int_to_ptr.vmem [resolvable:$true] %s20_s6  ;;  %s59_s0 = int_to_ptr.hbm [resolvable:$true] %s58_s0 }
   0xa   :  { %26 = dma.hbm_to_vmem [thread:$0]  %s19_s26, 512, %s21_s6, [#allocation3], %s776_s27, %s777_s28, %s778_s29  }
   0xb   :  { %s780_s11 = smov [#allocation7]   ;;  %s781_s13 = smov [#allocation8]  }
   0xc   :  { %s47_s12 = sshll.u32 %s780_s11, 4  ;;  %s60_s14 = sshll.u32 %s781_s13, 4  ;;  %s48_s12 = int_to_ptr.vmem [resolvable:$true] %s47_s12  ;;  %s61_s14 = int_to_ptr.vmem [resolvable:$true] %s60_s14 }
   0xd   :  { %53 = dma.hbm_to_vmem [thread:$0]  %s46_s1, 512, %s48_s12, [#allocation6], %s777_s28, %s777_s28, %s778_s29  }
   0xe   :  { %66 = dma.hbm_to_vmem [thread:$0]  %s59_s0, 512, %s61_s14, [#allocation9], %s777_s28, %s777_s28, %s778_s29  }
   0xf   :  { %767 = dma.done.wait [#allocation3], 512  }
  0x10   :  { %768 = vsyncadd [#allocation3], 4294966784 }
  0x11   :  { %769 = dma.done.wait [#allocation6], 1024  }
  0x12   :  { %770 = vsyncadd [#allocation6], 4294966272 }
  0x13   :  { %771 = dma.done.wait [#allocation9], 512  }
  0x14   :  { %772 = vsyncadd [#allocation9], 4294966784  ;;  %vm110_vm0 = vcmask 519168   ;;  %v828_v0 = vld [vmem:[#allocation2 + $0x18] sm:$0xf]  ;;  %vm440_vm15 = vcmask 523264  }
  0x15   :  { %v830_v1 = vld [vmem:[#allocation5 + $0x18] sm:$0xf]  ;;  %v832_v2 = vld [vmem:[#allocation2 + $0x10] sm:$0xf]  ;;  %v840_v6 = vld [vmem:[#allocation2 + $0x1c] sm:$0xf]  ;;  %v141_v25 = vmul.f32 %v828_v0, %v828_v0 }
  0x16   :  { %v108_v3 = vadd.f32 %v830_v1, %v828_v0  ;;  %v836_v4 = vld [vmem:[#allocation5 + $0x10] sm:$0xf]  ;;  %v139_v5 = vmul.f32 %v832_v2, %v832_v2  ;;  %v846_v9 = vld [vmem:[#allocation5 + $0x1c] sm:$0xf]  ;;  %v848_v10 = vld [vmem:[#allocation2 + $0x14] sm:$0xf]  ;;  %v142_v22 = vmul.f32 %v840_v6, %v840_v6  ;;  %v149_v26 = vmul.f32 %v830_v1, %v830_v1 }
  0x17   :  { %v106_v7 = vadd.f32 %v836_v4, %v832_v2  ;;  %v147_v8 = vmul.f32 %v836_v4, %v836_v4  ;;  %v850_v11 = vld [vmem:[#allocation5 + $0x14] sm:$0xf]  ;;  %v140_v15 = vmul.f32 %v848_v10, %v848_v10  ;;  %v109_v17 = vadd.f32 %v846_v9, %v840_v6  ;;  %v874_v29 = vld [vmem:[#allocation2] sm:$0xf]  ;;  %v882_v35 = vld [vmem:[#allocation2 + $0x8] sm:$0xf] }
  0x18   :  { %v129_v12 = vsel %vm110_vm0, %v108_v3, 0.0  ;;  %v148_v16 = vmul.f32 %v850_v11, %v850_v11  ;;  %v107_v19 = vadd.f32 %v850_v11, %v848_v10  ;;  %v150_v23 = vmul.f32 %v846_v9, %v846_v9  ;;  %v876_v30 = vld [vmem:[#allocation5] sm:$0xf]  ;;  %v884_v36 = vld [vmem:[#allocation5 + $0x8] sm:$0xf]  ;;  %s782_s15 = smov [#allocation10]  }
  0x19   :  { %130 = vadd.xlane.f32.xlu1 %v129_v12  ;;  %v123_v13 = vsel %vm110_vm0, %v106_v7, 0.0  ;;  %v155_v14 = vadd.f32 %v147_v8, %v139_v5  ;;  %v132_v21 = vsel %vm110_vm0, %v109_v17, 0.0  ;;  %v157_v31 = vadd.f32 %v149_v26, %v141_v25  ;;  %v886_v37 = vld [vmem:[#allocation2 + $0x4] sm:$0xf]  ;;  %v893_v41 = vld [vmem:[#allocation2 + $0xc] sm:$0xf] }
  0x1a   :  { %124 = vadd.xlane.f32.xlu0 %v123_v13  ;;  %v156_v20 = vadd.f32 %v148_v16, %v140_v15  ;;  %v126_v24 = vsel %vm110_vm0, %v107_v19, 0.0  ;;  %v158_v28 = vadd.f32 %v150_v23, %v142_v22  ;;  %v102_v32 = vadd.f32 %v876_v30, %v874_v29  ;;  %v888_v38 = vld [vmem:[#allocation5 + $0x4] sm:$0xf]  ;;  %v895_v42 = vld [vmem:[#allocation5 + $0xc] sm:$0xf]  ;;  %s552_s16 = sshll.u32 %s782_s15, 4  ;;  %s553_s16 = int_to_ptr.vmem [resolvable:$true] %s552_s16 }
  0x1b   :  { %v171_v18 = vsel %vm110_vm0, %v155_v14, 0.0  ;;  %v177_v34 = vsel %vm110_vm0, %v157_v31, 0.0  ;;  %v104_v40 = vadd.f32 %v884_v36, %v882_v35  ;;  %v103_v43 = vadd.f32 %v888_v38, %v886_v37  ;;  %s554_s18 = sshll.u32 %s1051_s5, 4  ;;  %s783_s19 = smov 8   ;;  %s555_s18 = int_to_ptr.hbm [resolvable:$true] %s554_s18 }
  0x1c   :  { %172 = vadd.xlane.f32.xlu2 %v171_v18  ;;  %v174_v27 = vsel %vm110_vm0, %v156_v20, 0.0  ;;  %v180_v33 = vsel %vm110_vm0, %v158_v28, 0.0  ;;  %v111_v39 = vsel %vm110_vm0, %v102_v32, 0.0  ;;  %v105_v44 = vadd.f32 %v895_v42, %v893_v41 }
  0x1d   :  { %v117_v45 = vsel %vm110_vm0, %v104_v40, 0.0  ;;  %v136_v46 = vmul.f32 %v886_v37, %v886_v37  ;;  %v144_v47 = vmul.f32 %v888_v38, %v888_v38  ;;  %v114_v48 = vsel %vm110_vm0, %v103_v43, 0.0 }
  0x1e   :  { %v135_v49 = vmul.f32 %v874_v29, %v874_v29  ;;  %v143_v50 = vmul.f32 %v876_v30, %v876_v30  ;;  %v120_v51 = vsel %vm110_vm0, %v105_v44, 0.0  ;;  %v137_v52 = vmul.f32 %v882_v35, %v882_v35 }
  0x1f   :  { %v145_v53 = vmul.f32 %v884_v36, %v884_v36  ;;  %v152_v54 = vadd.f32 %v144_v47, %v136_v46  ;;  %v138_v59 = vmul.f32 %v893_v41, %v893_v41  ;;  %v146_v60 = vmul.f32 %v895_v42, %v895_v42 }
  0x20   :  { %v151_v55 = vadd.f32 %v143_v50, %v135_v49 }
  0x21   :  { %133 = vadd.xlane.f32.xlu1 %v132_v21  ;;  %v153_v56 = vadd.f32 %v145_v53, %v137_v52  ;;  %v162_v57 = vsel %vm110_vm0, %v152_v54, 0.0  ;;  %v154_v62 = vadd.f32 %v146_v60, %v138_v59  ;;  %v608_v52 = vld [vmem:[#allocation7 + $0x18] sm:$0xff]  ;;  %v609_v60 = vld [vmem:[#allocation8] sm:$0xff] }
  0x22   :  { %127 = vadd.xlane.f32.xlu0 %v126_v24  ;;  %v159_v58 = vsel %vm110_vm0, %v151_v55, 0.0  ;;  %v612_v24 = vld [vmem:[#allocation8 + $0x18] sm:$0xff]  ;;  %617 = vmatpush.bf16.msra.mxu3 %v608_v52 }
  0x23   :  { %v165_v61 = vsel %vm110_vm0, %v153_v56, 0.0  ;;  %v168_v63 = vsel %vm110_vm0, %v154_v62, 0.0  ;;  %613 = vmatpush.bf16.msra.mxu2 %v612_v24  ;;  %449 = vmatpush.bf16.msra.mxu0 %v612_v24 }
  0x24   :  { %175 = vadd.xlane.f32.xlu2 %v174_v27  ;;  %521 = vmatpush.bf16.msra.mxu1 %v608_v52 }
  0x29   :  { %181 = vadd.xlane.f32.xlu1 %v180_v33 }
  0x2a   :  { %178 = vadd.xlane.f32.xlu0 %v177_v34  ;;  %v611_v34 = vld [vmem:[#allocation8 + $0x10] sm:$0xff] }
  0x2b   :  { %614 = vmatpush.bf16.msra.mxu2 %v611_v34  ;;  %450 = vmatpush.bf16.msra.mxu0 %v611_v34 }
  0x2c   :  { %112 = vadd.xlane.f32.xlu2 %v111_v39 }
  0x31   :  { %118 = vadd.xlane.f32.xlu1 %v117_v45 }
  0x32   :  { %115 = vadd.xlane.f32.xlu0 %v114_v48 }
  0x34   :  { %121 = vadd.xlane.f32.xlu2 %v120_v51  ;;  %v610_v51 = vld [vmem:[#allocation8 + $0x8] sm:$0xff] }
  0x35   :  { %615 = vmatpush.bf16.msra.mxu2 %v610_v51  ;;  %451 = vmatpush.bf16.msra.mxu0 %v610_v51 }
  0x39   :  { %163 = vadd.xlane.f32.xlu1 %v162_v57  ;;  %616 = vmatpush.bf16.msra.mxu2 %v609_v60 }
  0x3a   :  { %160 = vadd.xlane.f32.xlu0 %v159_v58  ;;  %452 = vmatpush.bf16.msra.mxu0 %v609_v60 }
  0x3c   :  { %166 = vadd.xlane.f32.xlu2 %v165_v61  ;;  %v607_v61 = vld [vmem:[#allocation7 + $0x10] sm:$0xff] }
  0x3d   :  { %618 = vmatpush.bf16.msra.mxu3 %v607_v61  ;;  %522 = vmatpush.bf16.msra.mxu1 %v607_v61 }
  0x42   :  { %169 = vadd.xlane.f32.xlu0 %v168_v63 }
  0x8c   :  { %v131_v3 = vpop.xlane.xlu1 %130 }
  0x8d   :  { %v125_v5 = vpop.xlane.xlu0 %124  ;;  %v934_v25 = vmul.f32 0.0078125, %v131_v3 }
  0x8e   :  { %v924_v7 = vmul.f32 0.0078125, %v125_v5 }
  0x8f   :  { %v173_v8 = vpop.xlane.xlu2 %172  ;;  %v205_v40 = vmul.f32 %v934_v25, %v934_v25 }
  0x90   :  { %v203_v12 = vmul.f32 %v924_v7, %v924_v7  ;;  %v195_v13 = vmul.f32 0.0078125, %v173_v8  ;;  %v315_v5 = vsub.f32 0.0, %v924_v7 }
  0x92   :  { %v211_v14 = vsub.f32 %v195_v13, %v203_v12 }
  0x94   :  { %v219_v15 = vmax.f32 %v211_v14, 0.0  ;;  %v134_v16 = vpop.xlane.xlu1 %133 }
  0x95   :  { %v128_v17 = vpop.xlane.xlu0 %127  ;;  %v930_v20 = vmul.f32 0.0078125, %v134_v16 }
  0x96   :  { %v227_v18 = vadd.f32 1e-05, %v219_v15  ;;  %v928_v19 = vmul.f32 0.0078125, %v128_v17  ;;  %v606_v15 = vld [vmem:[#allocation7 + $0x8] sm:$0xff] }
  0x97   :  { %v176_v21 = vpop.xlane.xlu2 %175  ;;  %v206_v26 = vmul.f32 %v930_v20, %v930_v20  ;;  %619 = vmatpush.bf16.msra.mxu3 %v606_v15  ;;  %v318_v24 = vsub.f32 0.0, %v930_v20  ;;  %523 = vmatpush.bf16.msra.mxu1 %v606_v15 }
  0x98   :  { %631 = vrsqrt.f32 %v227_v18  ;;  %v204_v22 = vmul.f32 %v928_v19, %v928_v19  ;;  %v196_v23 = vmul.f32 0.0078125, %v176_v21  ;;  %vm277_vm2 = vweird.f32 %v227_v18 }
  0x9a   :  { %v212_v27 = vsub.f32 %v196_v23, %v204_v22 }
  0x9c   :  { %v182_v28 = vpop.xlane.xlu1 %181  ;;  %v220_v31 = vmax.f32 %v212_v27, 0.0 }
  0x9d   :  { %v198_v32 = vmul.f32 0.0078125, %v182_v28  ;;  %v179_v33 = vpop.xlane.xlu0 %178 }
  0x9e   :  { %v632_v39 = vpop.eup %631  ;;  %v197_v43 = vmul.f32 0.0078125, %v179_v33  ;;  %v940_v45 = vadd.f32 1e-05, %v220_v31 }
  0x9f   :  { %v272_v44 = vmul.f32 %v632_v39, %v227_v18  ;;  %v214_v46 = vsub.f32 %v198_v32, %v206_v26  ;;  %v113_v47 = vpop.xlane.xlu2 %112  ;;  %vm278_vm1 = vweird.f32 %v632_v39 }
  0xa0   :  { %v213_v48 = vsub.f32 %v197_v43, %v205_v40  ;;  %633 = vrsqrt.f32 %v940_v45  ;;  %vm279_vm3 = vmor %vm277_vm2, %vm278_vm1  ;;  %v964_v21 = vmul.f32 0.0078125, %v113_v47  ;;  %vm287_vm5 = vweird.f32 %v940_v45 }
  0xa1   :  { %v273_v49 = vmul.f32 %v632_v39, %v272_v44  ;;  %v222_v50 = vmax.f32 %v214_v46, 0.0 }
  0xa2   :  { %v221_v53 = vmax.f32 %v213_v48, 0.0  ;;  %v199_v46 = vmul.f32 %v964_v21, %v964_v21 }
  0xa3   :  { %v274_v54 = vmul.f32 0.5, %v273_v49  ;;  %v943_v55 = vadd.f32 1e-05, %v222_v50 }
  0xa4   :  { %v945_v56 = vadd.f32 1e-05, %v221_v53  ;;  %v119_v57 = vpop.xlane.xlu1 %118  ;;  %v316_v53 = vsub.f32 0.0, %v928_v19 }
  0xa5   :  { %v275_v58 = vsub.f32 1.5, %v274_v54  ;;  %635 = vrsqrt.f32 %v943_v55  ;;  %v116_v59 = vpop.xlane.xlu0 %115  ;;  %v955_v13 = vmul.f32 0.0078125, %v119_v57  ;;  %vm307_vm8 = vweird.f32 %v943_v55 }
  0xa6   :  { %637 = vrsqrt.f32 %v945_v56  ;;  %v634_v62 = vpop.eup %633  ;;  %v957_v14 = vmul.f32 0.0078125, %v116_v59  ;;  %vm297_vm11 = vweird.f32 %v945_v56 }
  0xa7   :  { %v276_v63 = vmul.f32 %v632_v39, %v275_v58  ;;  %v949_v3 = vpop.xlane.xlu2 %121  ;;  %v282_v8 = vmul.f32 %v634_v62, %v940_v45  ;;  %vm288_vm4 = vweird.f32 %v634_v62 }
  0xa8   :  { %v200_v32 = vmul.f32 %v957_v14, %v957_v14  ;;  %vm289_vm6 = vmor %vm287_vm5, %vm288_vm4 }
  0xa9   :  { %v953_v12 = vsel %vm279_vm3, %v632_v39, %v276_v63  ;;  %v283_v18 = vmul.f32 %v634_v62, %v282_v8  ;;  %v605_v39 = vld [vmem:[#allocation7] sm:$0xff] }
  0xaa   :  { %v960_v16 = vmul.f32 %v315_v5, %v953_v12  ;;  %v355_v17 = vmul.f32 %v953_v12, %v836_v4  ;;  %v201_v4 = vmul.f32 %v955_v13, %v955_v13  ;;  %620 = vmatpush.bf16.msra.mxu3 %v605_v39  ;;  %524 = vmatpush.bf16.msra.mxu1 %v605_v39 }
  0xab   :  { %v636_v7 = vpop.eup %635  ;;  %v284_v26 = vmul.f32 0.5, %v283_v18 }
  0xac   :  { %v638_v22 = vpop.eup %637  ;;  %v363_v23 = vadd.f32 %v355_v17, %v960_v16  ;;  %v302_v27 = vmul.f32 %v636_v7, %v943_v55  ;;  %v164_v28 = vpop.xlane.xlu1 %163  ;;  %vm308_vm7 = vweird.f32 %v636_v7 }
  0xad   :  { %v292_v31 = vmul.f32 %v638_v22, %v945_v56  ;;  %v192_v33 = vmul.f32 0.0078125, %v164_v28  ;;  %v161_v34 = vpop.xlane.xlu0 %160  ;;  %v285_v43 = vsub.f32 1.5, %v284_v26  ;;  %vm298_vm9 = vweird.f32 %v638_v22  ;;  %vm309_vm10 = vmor %vm307_vm8, %vm308_vm7 }
  0xae   :  { %v371_v40 = vpack.c.bf16 %v363_v23, %v363_v23  ;;  %v303_v20 = vmul.f32 %v636_v7, %v302_v27  ;;  %v191_v48 = vmul.f32 0.0078125, %v161_v34  ;;  %v317_v26 = vsub.f32 0.0, %v934_v25  ;;  %vm299_vm12 = vmor %vm297_vm11, %vm298_vm9 }
  0xaf   :  { %v293_v44 = vmul.f32 %v638_v22, %v292_v31  ;;  %v208_v47 = vsub.f32 %v192_v33, %v200_v32  ;;  %v167_v49 = vpop.xlane.xlu2 %166  ;;  %v286_v50 = vmul.f32 %v634_v62, %v285_v43 }
  0xb0   :  { %404 = vst [vmem:[#allocation1 + $0x20] ss:$4 sm:$0xff] %v371_v40  ;;  %v304_v51 = vmul.f32 0.5, %v303_v20  ;;  %v193_v52 = vmul.f32 0.0078125, %v167_v49  ;;  %v207_v58 = vsub.f32 %v191_v48, %v199_v46  ;;  %v331_v40 = vmul.f32 %v953_v12, %v832_v2 }
  0xb1   :  { %v294_v54 = vmul.f32 0.5, %v293_v44  ;;  %v216_v57 = vmax.f32 %v208_v47, 0.0  ;;  %v290_v59 = vsel %vm289_vm6, %v634_v62, %v286_v50  ;;  %v985_v62 = vmul.f32 0.0078125, %v949_v3 }
  0xb2   :  { %v305_v60 = vsub.f32 1.5, %v304_v51  ;;  %v209_v61 = vsub.f32 %v193_v52, %v201_v4  ;;  %v324_v63 = vmul.f32 %v316_v53, %v290_v59  ;;  %v356_v5 = vmul.f32 %v290_v59, %v850_v11 }
  0xb3   :  { %v295_v45 = vsub.f32 1.5, %v294_v54  ;;  %v981_v15 = vadd.f32 1e-05, %v216_v57  ;;  %v215_v19 = vmax.f32 %v207_v58, 0.0  ;;  %v202_v33 = vmul.f32 %v985_v62, %v985_v62 }
  0xb4   :  { %v306_v8 = vmul.f32 %v636_v7, %v305_v60  ;;  %v364_v17 = vadd.f32 %v356_v5, %v324_v63  ;;  %v217_v55 = vmax.f32 %v209_v61, 0.0  ;;  %v332_v44 = vmul.f32 %v290_v59, %v848_v10 }
  0xb5   :  { %v296_v18 = vmul.f32 %v638_v22, %v295_v45  ;;  %639 = vrsqrt.f32 %v981_v15  ;;  %v988_v11 = vadd.f32 1e-05, %v215_v19  ;;  %v170_v31 = vpop.xlane.xlu0 %169  ;;  %v339_v2 = vadd.f32 %v331_v40, %v960_v16 }
  0xb6   :  { %v310_v23 = vsel %vm309_vm10, %v636_v7, %v306_v8  ;;  %v372_v27 = vpack.c.bf16 %v364_v17, %v364_v17  ;;  %v997_v34 = vadd.f32 1e-05, %v217_v55  ;;  %v194_v25 = vmul.f32 0.0078125, %v170_v31 }
  0xb7   :  { %v326_v28 = vmul.f32 %v318_v24, %v310_v23  ;;  %v358_v4 = vmul.f32 %v310_v23, %v846_v9  ;;  %v300_v32 = vsel %vm299_vm12, %v638_v22, %v296_v18  ;;  %641 = vrsqrt.f32 %v988_v11 }
  0xb8   :  { %407 = vst [vmem:[#allocation1 + $0x21] ss:$4 sm:$0xff] %v372_v27  ;;  %v325_v56 = vmul.f32 %v317_v26, %v300_v32  ;;  %v357_v3 = vmul.f32 %v300_v32, %v830_v1  ;;  %643 = vrsqrt.f32 %v997_v34  ;;  %v210_v22 = vsub.f32 %v194_v25, %v202_v33 }
  0xb9   :  { %v366_v7 = vadd.f32 %v358_v4, %v326_v28  ;;  %v333_v46 = vmul.f32 %v300_v32, %v828_v0  ;;  %v334_v12 = vmul.f32 %v310_v23, %v840_v6  ;;  %v340_v54 = vadd.f32 %v332_v44, %v324_v63 }
  0xba   :  { %v365_v24 = vadd.f32 %v357_v3, %v325_v56  ;;  %v218_v47 = vmax.f32 %v210_v22, 0.0  ;;  %v347_v59 = vpack.c.bf16 %v339_v2, %v339_v2  ;;  %vm247_vm14 = vweird.f32 %v981_v15 }
  0xbb   :  { %v640_v39 = vpop.eup %639  ;;  %v374_v9 = vpack.c.bf16 %v366_v7, %v366_v7  ;;  %v341_v57 = vadd.f32 %v333_v46, %v325_v56  ;;  %v342_v60 = vadd.f32 %v334_v12, %v326_v28  ;;  %v348_v5 = vpack.c.bf16 %v340_v54, %v340_v54 }
  0xbc   :  { %v373_v43 = vpack.c.bf16 %v365_v24, %v365_v24  ;;  %v242_v20 = vmul.f32 %v640_v39, %v981_v15  ;;  %v1008_v50 = vadd.f32 1e-05, %v218_v47  ;;  %vm248_vm13 = vweird.f32 %v640_v39 }
  0xbd   :  { %v642_v1 = vpop.eup %641  ;;  %413 = vst [vmem:[#allocation1 + $0x23] ss:$4 sm:$0xff] %v374_v9  ;;  %v312_v63 = vsub.f32 0.0, %v957_v14  ;;  %vm249_vm1 = vmor %vm247_vm14, %vm248_vm13  ;;  %vm237_vm2 = vweird.f32 %v988_v11  ;;  %v349_v8 = vpack.c.bf16 %v341_v57, %v341_v57  ;;  %v350_v23 = vpack.c.bf16 %v342_v60, %v342_v60 }
  0xbe   :  { %410 = vst [vmem:[#allocation1 + $0x22] ss:$4 sm:$0xff] %v373_v43  ;;  %v243_v48 = vmul.f32 %v640_v39, %v242_v20  ;;  %v232_v49 = vmul.f32 %v642_v1, %v988_v11  ;;  %v644_v53 = vpop.eup %643  ;;  %645 = vrsqrt.f32 %v1008_v50  ;;  %vm238_vm0 = vweird.f32 %v642_v1 }
  0xbf   :  { %v252_v58 = vmul.f32 %v644_v53, %v997_v34  ;;  %v311_v55 = vsub.f32 0.0, %v964_v21  ;;  %vm239_vm3 = vmor %vm237_vm2, %vm238_vm0  ;;  %vm258_vm4 = vweird.f32 %v644_v53  ;;  %vm257_vm5 = vweird.f32 %v997_v34 }
  0xc0   :  { %v244_v51 = vmul.f32 0.5, %v243_v48  ;;  %v233_v52 = vmul.f32 %v642_v1, %v232_v49  ;;  %vm259_vm6 = vmor %vm257_vm5, %vm258_vm4  ;;  %vm267_vm8 = vweird.f32 %v1008_v50 }
  0xc1   :  { %v253_v61 = vmul.f32 %v644_v53, %v252_v58 }
  0xc2   :  { %v245_v10 = vsub.f32 1.5, %v244_v51  ;;  %v234_v0 = vmul.f32 0.5, %v233_v52 }
  0xc3   :  { %v254_v18 = vmul.f32 0.5, %v253_v61 }
  0xc4   :  { %v246_v6 = vmul.f32 %v640_v39, %v245_v10  ;;  %v235_v16 = vsub.f32 1.5, %v234_v0  ;;  %v646_v15 = vpop.eup %645 }
  0xc5   :  { %v415_v45 = vld.sshfl [vmem:[#allocation1 + $0x20] sm:$0xff pattern:$0x73625140]  ;;  %v255_v11 = vsub.f32 1.5, %v254_v18  ;;  %v262_v28 = vmul.f32 %v646_v15, %v1008_v50  ;;  %vm268_vm7 = vweird.f32 %v646_v15 }
  0xc6   :  { %v250_v19 = vsel %vm249_vm1, %v640_v39, %v246_v6  ;;  %v236_v17 = vmul.f32 %v642_v1, %v235_v16  ;;  %586 = vmatmul.msk.bf16.vlgmr.msra.gmra.mxu2 %vm440_vm15, %v415_v45  ;;  %477 = vst [vmem:[#allocation1 + $0x20] ss:$4 sm:$0xff] %v347_v59  ;;  %vm269_vm9 = vmor %vm267_vm8, %vm268_vm7 }
  0xc7   :  { %v320_v26 = vmul.f32 %v312_v63, %v250_v19  ;;  %v352_v27 = vmul.f32 %v250_v19, %v888_v38  ;;  %480 = vst [vmem:[#allocation1 + $0x21] ss:$4 sm:$0xff] %v348_v5  ;;  %v256_v56 = vmul.f32 %v644_v53, %v255_v11  ;;  %v263_v21 = vmul.f32 %v646_v15, %v262_v28 }
  0xc8   :  { %v240_v14 = vsel %vm239_vm3, %v642_v1, %v236_v17  ;;  %483 = vst [vmem:[#allocation1 + $0x22] ss:$4 sm:$0xff] %v349_v8  ;;  %v313_v38 = vsub.f32 0.0, %v955_v13  ;;  %v314_v13 = vsub.f32 0.0, %v985_v62  ;;  %v328_v48 = vmul.f32 %v250_v19, %v886_v37 }
  0xc9   :  { %v360_v31 = vadd.f32 %v352_v27, %v320_v26  ;;  %v319_v4 = vmul.f32 %v311_v55, %v240_v14  ;;  %486 = vst [vmem:[#allocation1 + $0x23] ss:$4 sm:$0xff] %v350_v23  ;;  %v351_v32 = vmul.f32 %v240_v14, %v876_v30  ;;  %v260_v33 = vsel %vm259_vm6, %v644_v53, %v256_v56 }
  0xca   :  { %v264_v25 = vmul.f32 0.5, %v263_v21  ;;  %v321_v24 = vmul.f32 %v313_v38, %v260_v33  ;;  %v353_v39 = vmul.f32 %v260_v33, %v884_v36  ;;  %v327_v46 = vmul.f32 %v240_v14, %v874_v29 }
  0xcb   :  { %v368_v3 = vpack.c.bf16 %v360_v31, %v360_v31  ;;  %v359_v7 = vadd.f32 %v351_v32, %v319_v4  ;;  %v329_v49 = vmul.f32 %v260_v33, %v882_v35  ;;  %v336_v12 = vadd.f32 %v328_v48, %v320_v26 }
  0xcc   :  { %v265_v9 = vsub.f32 1.5, %v264_v25  ;;  %v361_v22 = vadd.f32 %v353_v39, %v321_v24  ;;  %v335_v2 = vadd.f32 %v327_v46, %v319_v4 }
  0xcd   :  { %395 = vst [vmem:[#allocation1 + $0x1] ss:$4 sm:$0xff] %v368_v3  ;;  %v367_v40 = vpack.c.bf16 %v359_v7, %v359_v7  ;;  %v337_v50 = vadd.f32 %v329_v49, %v321_v24  ;;  %v344_v53 = vpack.c.bf16 %v336_v12, %v336_v12 }
  0xce   :  { %v266_v30 = vmul.f32 %v646_v15, %v265_v9  ;;  %v369_v43 = vpack.c.bf16 %v361_v22, %v361_v22  ;;  %v343_v52 = vpack.c.bf16 %v335_v2, %v335_v2 }
  0xcf   :  { %392 = vst [vmem:[#allocation1] ss:$4 sm:$0xff] %v367_v40  ;;  %v345_v57 = vpack.c.bf16 %v337_v50, %v337_v50 }
  0xd0   :  { %v488_v34 = vld.sshfl [vmem:[#allocation1 + $0x20] sm:$0xff pattern:$0x73625140]  ;;  %v270_v20 = vsel %vm269_vm9, %v646_v15, %v266_v30  ;;  %398 = vst [vmem:[#allocation1 + $0x2] ss:$4 sm:$0xff] %v369_v43 }
  0xd1   :  { %604 = vmatmul.msk.bf16.vlgmr.msra.gmra.mxu3 %vm440_vm15, %v488_v34  ;;  %v322_v1 = vmul.f32 %v314_v13, %v270_v20  ;;  %v354_v36 = vmul.f32 %v270_v20, %v895_v42  ;;  %v330_v62 = vmul.f32 %v270_v20, %v893_v41  ;;  %v630_v41 = vld [vmem:[%s1050_s4] ss:$0 sm:$0xff] }
  0xd3   :  { %v362_v44 = vadd.f32 %v354_v36, %v322_v1  ;;  %v338_v51 = vadd.f32 %v330_v62, %v322_v1 }
  0xd5   :  { %v370_v47 = vpack.c.bf16 %v362_v44, %v362_v44  ;;  %v346_v29 = vpack.c.bf16 %v338_v51, %v338_v51 }
  0xd7   :  { %401 = vst [vmem:[#allocation1 + $0x3] ss:$4 sm:$0xff] %v370_v47 }
  0xde   :  { %v414_v54 = vld.sshfl [vmem:[#allocation1] sm:$0xff pattern:$0x73625140] }
  0xdf   :  { %585 = vmatmul.msk.bf16.vlgmr.msra.gmra.mxu0 %vm440_vm15, %v414_v54  ;;  %465 = vst [vmem:[#allocation1] ss:$4 sm:$0xff] %v343_v52 }
  0xe0   :  { %468 = vst [vmem:[#allocation1 + $0x1] ss:$4 sm:$0xff] %v344_v53 }
  0xe1   :  { %471 = vst [vmem:[#allocation1 + $0x2] ss:$4 sm:$0xff] %v345_v57 }
  0xe2   :  { %474 = vst [vmem:[#allocation1 + $0x3] ss:$4 sm:$0xff] %v346_v29 }
  0xe9   :  { %v487_v37 = vld.sshfl [vmem:[#allocation1] sm:$0xff pattern:$0x73625140] }
  0xea   :  { %603 = vmatmul.msk.bf16.vlgmr.msra.gmra.mxu1 %vm440_vm15, %v487_v37 }
 0x149   :  { %v459_v35 = vpop.f32.mrf.mxu2 }
 0x151   :  { %v461_v58 = vpop.f32.mrf.mxu2 }
 0x154   :  { %v531_v42 = vpop.f32.mrf.mxu3 }
 0x155   :  { %v532_v10 = vadd.f32 %v531_v42, %v459_v35 }
 0x157   :  { %v542_v0 = vadd.f32 %v630_v41, %v532_v10 }
 0x159   :  { %546 = vst.msk [vmem:[#allocation10 + $0x10] sm:$0xff] %vm440_vm15, %v542_v0 }
 0x15c   :  { %v533_v59 = vpop.f32.mrf.mxu3  ;;  %v454_v16 = vpop.f32.mrf.mxu0 }
 0x15d   :  { %v534_v60 = vadd.f32 %v533_v59, %v461_v58 }
 0x15f   :  { %v543_v6 = vadd.f32 %v630_v41, %v534_v60 }
 0x161   :  { %547 = vst.msk [vmem:[#allocation10 + $0x18] sm:$0xff] %vm440_vm15, %v543_v6 }
 0x164   :  { %v456_v45 = vpop.f32.mrf.mxu0 }
 0x167   :  { %v526_v61 = vpop.f32.mrf.mxu1 }
 0x168   :  { %v527_v5 = vadd.f32 %v526_v61, %v454_v16 }
 0x16a   :  { %v540_v63 = vadd.f32 %v630_v41, %v527_v5 }
 0x16c   :  { %544 = vst.msk [vmem:[#allocation10] sm:$0xff] %vm440_vm15, %v540_v63 }
 0x16f   :  { %v528_v8 = vpop.f32.mrf.mxu1 }
 0x170   :  { %v529_v19 = vadd.f32 %v528_v8, %v456_v45 }
 0x172   :  { %v541_v17 = vadd.f32 %v630_v41, %v529_v19 }
 0x174   :  { %545 = vst.msk [vmem:[#allocation10 + $0x8] sm:$0xff] %vm440_vm15, %v541_v17 }
 0x175   :  { %560 = dma.vmem_to_hbm [thread:$0]  %s553_s16, 512, %s555_s18, [#allocation4], %s776_s27, %s776_s27, %s783_s19  }
 0x176   :  { %773 = dma.done.wait [#allocation4], 512  }
 0x177   :  { %774 = vsyncadd [#allocation4], 4294966784 }
 0x178   :  { %565 = vsyncpa [#allocation3], 1 }
 0x179   :  { %566 = vsyncpa [#allocation6], 1 }
 0x17a   :  { %567 = vsyncpa [#allocation9], 1 }
 0x17b   :  { %568 = vsyncpa [#allocation4], 1 }

</bundles_post_ra>
